<compile_context>
chip_gen: v6e
topology: v6e:2x2x1
jax: 0.10.0
libtpu: 0.0.40
codegen_flags: <defaults>
</compile_context>

<pallas_src>
import math

import jax
import jax.numpy as jnp
from jax.experimental import pallas as pl
from jax.experimental.pallas import tpu as pltpu


def _round_up(x: int, m: int) -> int:
    return ((x + m - 1) // m) * m


def _k_tiling(in_features: int, tk_default: int):
    """Pick the contraction tile tk (multiple of 128) and the zero-padded IN size.

    IN is padded to a multiple of tk so every K grid step reads only valid (or zero)
    data; zeros do not change the dot product.
    """
    tk = min(_round_up(tk_default, 128), _round_up(in_features, 128))
    return tk, _round_up(in_features, tk)


def dense_kernel(x_ref, w_ref, b_ref, o_ref, acc_ref):
    k = pl.program_id(2)

    @pl.when(k == 0)
    def _init():
        acc_ref[...] = jnp.zeros_like(acc_ref)

    acc_ref[...] += jnp.dot(x_ref[...], w_ref[...],
                            preferred_element_type=jnp.float32)

    @pl.when(k == pl.num_programs(2) - 1)
    def _finalize():
        o_ref[...] = (acc_ref[...] + b_ref[...]).astype(o_ref.dtype)


def prepare_dense_params(weight, bias, *, compute_dtype=jnp.bfloat16, tk_default=1024):
    """One-time (hoisted out of the hot path) parameter transform.

    weight: (OUT, IN) as stored by nn.Linear; bias: (OUT,).
    Returns (w_t_padded (IN_pad, OUT) in compute_dtype, bias (1, OUT) in f32).
    """
    out_features, in_features = weight.shape
    _, in_pad = _k_tiling(in_features, tk_default)
    w_t = jnp.asarray(weight).T.astype(compute_dtype)
    if in_pad != in_features:
        w_t = jnp.pad(w_t, ((0, in_pad - in_features), (0, 0)))
    b2d = jnp.asarray(bias).astype(jnp.float32).reshape(1, out_features)
    return w_t, b2d


def dense_forward(
    x,
    w_t,                      # (IN_pad, OUT), from prepare_dense_params
    b2d,                      # (1, OUT) float32, from prepare_dense_params
    *,
    tm: int = 512,            # batch tile  (multiple of 8)
    tn: int = 512,            # output tile (multiple of 128)
    tk_default: int = 1024,   # contraction tile (multiple of 128) -- must match prep
    out_dtype=None,           # defaults to x.dtype; pass bf16 to halve output writes
    vmem_cap_bytes: int = 56 * 1024 * 1024,   # stay under v7x's 64 MiB VMEM
):
    """x: (B, IN). Returns (B, OUT) = x @ W^T + b."""
    B, IN = x.shape
    in_pad_w, OUT = w_t.shape
    tk, IN_pad = _k_tiling(IN, tk_default)
    assert IN_pad == in_pad_w, "weight was prepared with a different tk_default / IN"
    compute_dtype = w_t.dtype
    out_dtype = x.dtype if out_dtype is None else out_dtype

    # Clamp tiles to the problem size (no batch/OUT over-padding; ragged last blocks
    # are masked by Pallas).
    tm = _round_up(min(tm, _round_up(B, 8)), 8)
    tn = _round_up(min(tn, _round_up(OUT, 128)), 128)

    xc = x.astype(compute_dtype)
    if IN_pad != IN:
        xc = jnp.pad(xc, ((0, 0), (0, IN_pad - IN)))

    # OUT tiles outermost, batch tiles inner, K last ("arbitrary").  For small-batch
    # (single batch tile) the weight panel streams exactly once.
    grid = (pl.cdiv(OUT, tn), pl.cdiv(B, tm), IN_pad // tk)

    # VMEM accounting: double-buffered inputs + double-buffered output + accumulator.
    in_b = jnp.dtype(compute_dtype).itemsize
    out_b = jnp.dtype(out_dtype).itemsize
    footprint = (2 * (tm * tk + tk * tn) * in_b
                 + 2 * tm * tn * out_b
                 + tm * tn * 4
                 + 2 * tn * 4)
    vmem_limit = min(vmem_cap_bytes, max(32 * 1024 * 1024, 2 * footprint))

    return pl.pallas_call(
        dense_kernel,
        out_shape=jax.ShapeDtypeStruct((B, OUT), out_dtype),
        grid_spec=pltpu.PrefetchScalarGridSpec(
            num_scalar_prefetch=0,
            grid=grid,
            in_specs=[
                pl.BlockSpec((tm, tk), lambda j, i, k: (i, k)),   # x tile
                pl.BlockSpec((tk, tn), lambda j, i, k: (k, j)),   # weight panel tile
                pl.BlockSpec((1, tn), lambda j, i, k: (0, j)),    # bias tile
            ],
            out_specs=pl.BlockSpec((tm, tn), lambda j, i, k: (i, j)),
            scratch_shapes=[pltpu.VMEM((tm, tn), jnp.float32)],
        ),
        compiler_params=pltpu.CompilerParams(
            dimension_semantics=("parallel", "parallel", "arbitrary"),
            vmem_limit_bytes=int(vmem_limit),
        ),
    )(xc, w_t, b2d)


if __name__ == "__main__":
    # Shapes consistent with the module: df_numeric -> (batch, input_size), output_size=128.
    batch, input_size, output_size = 8, 32, 128

    key = jax.random.PRNGKey(0)
    kx, kw, kb, kx2, kw2, kb2 = jax.random.split(key, 6)

    # Deterministic params mimicking nn.Linear default init: U(-1/sqrt(in), 1/sqrt(in)).
    bound = 1.0 / math.sqrt(input_size)
    weight = jax.random.uniform(kw, (output_size, input_size),
                                minval=-bound, maxval=bound, dtype=jnp.float32)
    bias = jax.random.uniform(kb, (output_size,),
                              minval=-bound, maxval=bound, dtype=jnp.float32)
    x = jax.random.normal(kx, (batch, input_size), dtype=jnp.float32)
    ref = jnp.dot(x, weight.T, precision=jax.lax.Precision.HIGHEST) + bias

    # 1) Production path: hoisted one-time bf16 weight prep, bf16 operands / f32 accumulation.
    w_t, b2d = prepare_dense_params(weight, bias)
    out = jax.block_until_ready(dense_forward(x, w_t, b2d))
    assert out.shape == (batch, output_size)
    assert jnp.allclose(out, ref, atol=3e-2, rtol=3e-2), "bf16 path mismatch vs reference"

    # 2) f32 debug path for a tight numerical check of the kernel itself.
    w_t32, b2d32 = prepare_dense_params(weight, bias, compute_dtype=jnp.float32)
    out32 = jax.block_until_ready(dense_forward(x, w_t32, b2d32))
    assert jnp.allclose(out32, ref, atol=1e-5, rtol=1e-5), "f32 path mismatch vs reference"

    # 3) Multi-tile path: K-tiled contraction plus ragged batch / output dims (masked
    #    stores, no padding of B or OUT), using small tiles so the 3-D grid actually loops.
    B2, IN2, OUT2 = 300, 700, 300
    w2 = jax.random.uniform(kw2, (OUT2, IN2), minval=-0.05, maxval=0.05, dtype=jnp.float32)
    b2 = jax.random.uniform(kb2, (OUT2,), minval=-0.05, maxval=0.05, dtype=jnp.float32)
    x2 = jax.random.normal(kx2, (B2, IN2), dtype=jnp.float32)
    ref2 = jnp.dot(x2, w2.T, precision=jax.lax.Precision.HIGHEST) + b2
    w2_t, b2_2d = prepare_dense_params(w2, b2, compute_dtype=jnp.float32, tk_default=256)
    out2 = jax.block_until_ready(
        dense_forward(x2, w2_t, b2_2d, tm=128, tn=128, tk_default=256))
    assert out2.shape == (B2, OUT2)
    assert jnp.allclose(out2, ref2, atol=1e-4, rtol=1e-4), "ragged multi-tile path mismatch"

    print("KERNEL_OK")
</pallas_src>

<mosaic_0001>
module attributes {stable_mosaic.version = 11 : i64} {
  func.func @dense_kernel(%arg0: i32, %arg1: i32, %arg2: i32, %arg3: memref<8x128xbf16, #tpu.memory_space<vmem>>, %arg4: memref<128x128xbf16, #tpu.memory_space<vmem>>, %arg5: memref<1x128xf32, #tpu.memory_space<vmem>>, %arg6: memref<8x128xf32, #tpu.memory_space<vmem>>, %arg7: memref<8x128xf32, #tpu.memory_space<vmem>>) attributes {dimension_semantics = [#tpu.dimension_semantics<parallel>, #tpu.dimension_semantics<parallel>, #tpu.dimension_semantics<arbitrary>], iteration_bounds = array<i64: 1, 1, 1>, scalar_prefetch = 0 : i64, scratch_operands = 1 : i64, tpu.core_type = #tpu.core_type<tc>, window_params = [{transform_indices = @transform_0, window_bounds = array<i64: 8, 128>}, {transform_indices = @transform_1, window_bounds = array<i64: 128, 128>}, {transform_indices = @transform_2, window_bounds = array<i64: 1, 128>}, {transform_indices = @transform_3, window_bounds = array<i64: 8, 128>}]} {
    %c0_i32 = arith.constant 0 : i32
    %0 = arith.cmpi eq, %arg2, %c0_i32 : i32
    %1 = arith.extui %0 : i1 to i32
    %c0_i32_0 = arith.constant 0 : i32
    %2 = arith.cmpi ne, %1, %c0_i32_0 : i32
    scf.if %2 {
      %cst_10 = arith.constant 0.000000e+00 : f32
      %12 = vector.broadcast %cst_10 : f32 to vector<8x128xf32>
      %c0_11 = arith.constant 0 : index
      %c0_12 = arith.constant 0 : index
      %13 = vector.load %arg7[%c0_11, %c0_12] : memref<8x128xf32, #tpu.memory_space<vmem>>, vector<8x128xf32>
      tpu.vector_store %arg7[%c0_11, %c0_12], %12 {strides = array<i32>} : memref<8x128xf32, #tpu.memory_space<vmem>>, vector<8x128xf32>,
    } else {
    }
    %c0 = arith.constant 0 : index
    %c0_1 = arith.constant 0 : index
    %3 = vector.load %arg7[%c0, %c0_1] : memref<8x128xf32, #tpu.memory_space<vmem>>, vector<8x128xf32>
    %c0_2 = arith.constant 0 : index
    %c0_3 = arith.constant 0 : index
    %4 = vector.load %arg3[%c0_2, %c0_3] : memref<8x128xbf16, #tpu.memory_space<vmem>>, vector<8x128xbf16>
    %c0_4 = arith.constant 0 : index
    %c0_5 = arith.constant 0 : index
    %5 = vector.load %arg4[%c0_4, %c0_5] : memref<128x128xbf16, #tpu.memory_space<vmem>>, vector<128x128xbf16>
    %cst = arith.constant dense<0.000000e+00> : vector<8x128xf32>
    %6 = tpu.matmul %4, %5, %cst {dimension_numbers = #tpu.dot_dimension_numbers<[1], [0], [0], [1], [0, 0, 1, 1], [], []>} : vector<8x128xbf16>, vector<128x128xbf16>, vector<8x128xf32> -> vector<8x128xf32>
    %7 = arith.addf %3, %6 : vector<8x128xf32>
    %c0_6 = arith.constant 0 : index
    %c0_7 = arith.constant 0 : index
    %8 = vector.load %arg7[%c0_6, %c0_7] : memref<8x128xf32, #tpu.memory_space<vmem>>, vector<8x128xf32>
    tpu.vector_store %arg7[%c0_6, %c0_7], %7 {strides = array<i32>} : memref<8x128xf32, #tpu.memory_space<vmem>>, vector<8x128xf32>,
    %c0_i32_8 = arith.constant 0 : i32
    %9 = arith.cmpi eq, %arg2, %c0_i32_8 : i32
    %10 = arith.extui %9 : i1 to i32
    %c0_i32_9 = arith.constant 0 : i32
    %11 = arith.cmpi ne, %10, %c0_i32_9 : i32
    scf.if %11 {
      %c0_10 = arith.constant 0 : index
      %c0_11 = arith.constant 0 : index
      %12 = vector.load %arg7[%c0_10, %c0_11] : memref<8x128xf32, #tpu.memory_space<vmem>>, vector<8x128xf32>
      %c0_12 = arith.constant 0 : index
      %c0_13 = arith.constant 0 : index
      %13 = vector.load %arg5[%c0_12, %c0_13] : memref<1x128xf32, #tpu.memory_space<vmem>>, vector<1x128xf32>
      %14 = vector.broadcast %13 : vector<1x128xf32> to vector<8x128xf32>
      %15 = arith.addf %12, %14 : vector<8x128xf32>
      %c0_14 = arith.constant 0 : index
      %c0_15 = arith.constant 0 : index
      %16 = vector.load %arg6[%c0_14, %c0_15] : memref<8x128xf32, #tpu.memory_space<vmem>>, vector<8x128xf32>
      tpu.vector_store %arg6[%c0_14, %c0_15], %15 {strides = array<i32>} : memref<8x128xf32, #tpu.memory_space<vmem>>, vector<8x128xf32>,
    } else {
    }
    return
  }
  func.func @transform_0(%arg0: i32, %arg1: i32, %arg2: i32) -> (i32, i32) {
    %c0_i32 = arith.constant 0 : i32
    return %arg1, %arg2 : i32, i32
  }
  func.func @transform_1(%arg0: i32, %arg1: i32, %arg2: i32) -> (i32, i32) {
    %c0_i32 = arith.constant 0 : i32
    return %arg2, %arg0 : i32, i32
  }
  func.func @transform_2(%arg0: i32, %arg1: i32, %arg2: i32) -> (i32, i32) {
    %c0_i32 = arith.constant 0 : i32
    %c0_i32_0 = arith.constant 0 : i32
    return %c0_i32, %arg0 : i32, i32
  }
  func.func @transform_3(%arg0: i32, %arg1: i32, %arg2: i32) -> (i32, i32) {
    %c0_i32 = arith.constant 0 : i32
    return %arg1, %arg0 : i32, i32
  }
}

</mosaic_0001>

<bundles_post_ra>
// kernel: tpu_custom_call.1
= control target key start
LH: loop header
LB: loop body
LE: loop exit
PB: predicated region body
PF: predicated region fallthrough
CT: control target
= control target key end

     0   :  { %8 = vsyncpa [#allocation4], 0  ;;  %s342_s0 = inlined_call_operand.hbm [shape: bf16[8,128], index: 0, kind: input, shape index: {}]   ;;  %s343_s1 = inlined_call_operand.hbm [shape: bf16[128,128], index: 1, kind: input, shape index: {}]   ;;  %s344_s2 = inlined_call_operand.vmem [shape: f32[1,128], index: 2, kind: input, shape index: {}]   ;;  %s345_s3 = inlined_call_operand.hbm [shape: f32[8,128], index: 3, kind: output, shape index: {}]  }
   0x1   :  { %9 = vsyncpa [#allocation7], 0 }
   0x2   :  { %10 = vsyncpa [#allocation5], 0  ;;  %s303_s12 = smov [#allocation3]   ;;  %s304_s14 = smov [#allocation6]  }
   0x3   :  { %s17_s13 = sshll.u32 %s303_s12, 4  ;;  %s26_s15 = sshll.u32 %s304_s14, 4  ;;  %s18_s13 = int_to_ptr.vmem [resolvable:$true] %s17_s13  ;;  %s27_s15 = int_to_ptr.vmem [resolvable:$true] %s26_s15 }
   0x4   :  { %s245_s16 = scalar_lea.vmem %s18_s13, 64  ;;  %p250_p1 = scmp.lt.s32.totalorder %s18_s13, %s18_s13 }
   0x5   :  { %p246_p0 = scmp.ne.s32.totalorder %s18_s13, %s245_s16  ;;  %p251_p2 = scmp.lt.s32.totalorder %s245_s16, %s245_s16 }
   0x7   :  { %p252_p3 = por %p251_p2, %p250_p1 }
   0x9   :  { %p253_p4 = pnand %p252_p3, %p246_p0 }
   0xb   :  { %256 = shalt.err (!%p253_p4)
}
   0xc   :  { %20 = dma.hbm_to_vmem [thread:$0]  %s342_s0, 64, %s18_s13, [#allocation4]  }
   0xd   :  { %s265_s19 = scalar_lea.vmem %s27_s15, 1024  ;;  %p270_p6 = scmp.lt.s32.totalorder %s27_s15, %s27_s15 }
   0xe   :  { %p266_p5 = scmp.ne.s32.totalorder %s27_s15, %s265_s19  ;;  %p271_p7 = scmp.lt.s32.totalorder %s265_s19, %s265_s19 }
  0x10   :  { %p272_p8 = por %p271_p7, %p270_p6 }
  0x12   :  { %p273_p9 = pnand %p272_p8, %p266_p5 }
  0x14   :  { %276 = shalt.err (!%p273_p9)
}
  0x15   :  { %s305_s20 = smov 64   ;;  %s306_s21 = smov 4  }
  0x16   :  { %32 = dma.hbm_to_vmem [thread:$0]  %s343_s1, 1024, %s27_s15, [#allocation7], %s305_s20, %s305_s20, %s306_s21  }
  0x17   :  { %297 = dma.done.wait [#allocation4], 64  }
  0x18   :  { %298 = vsyncadd [#allocation4], 4294967232 }
  0x19   :  { %299 = dma.done.wait [#allocation7], 1024  }
  0x1a   :  { %300 = vsyncadd [#allocation7], 4294966272  ;;  %v307_v0 = vmov 0.0   ;;  %vm308_vm0 = vmmov 0   ;;  %v229_v1 = vld [vmem:[#allocation6 + $0x38] sm:$0xff]   ;;  %v230_v2 = vld [vmem:[#allocation6 + $0x30] sm:$0xff]  }
  0x1b   :  { %202 = vmatprep.subr.bf16.mxu0 %v307_v0  ;;  %218 = vmatprep.mubr.msk.bf16.mxu0 %vm308_vm0, %v307_v0  ;;  %v231_v3 = vld [vmem:[#allocation6 + $0x28] sm:$0xff]   ;;  %v232_v4 = vld [vmem:[#allocation6 + $0x20] sm:$0xff]   ;;  %v233_v5 = vld [vmem:[#allocation6 + $0x18] sm:$0xff]   ;;  %s309_s24 = smov [#allocation8]  }
  0x1c   :  { %203 = vmatpush3.bf16.msra.mxu0 %v229_v1  ;;  %v234_v6 = vld [vmem:[#allocation6 + $0x10] sm:$0xff]   ;;  %v235_v7 = vld [vmem:[#allocation6 + $0x8] sm:$0xff]   ;;  %v236_v8 = vld [vmem:[#allocation6] sm:$0xff]   ;;  %s174_s25 = sshll.u32 %s309_s24, 4  ;;  %s175_s25 = int_to_ptr.vmem [resolvable:$true] %s174_s25 }
  0x1d   :  { %204 = vmatprep.subr.bf16.mxu0 %v307_v0  ;;  %v48_v9 = vld [vmem:[#allocation3] sm:$0xf]  ;;  %s277_s26 = scalar_lea.vmem %s175_s25, 128  ;;  %p282_p11 = scmp.lt.s32.totalorder %s175_s25, %s175_s25 }
  0x1e   :  { %v192_v10 = vld [vmem:[%s344_s2] ss:$0 sm:$0xff]  ;;  %p278_p10 = scmp.ne.s32.totalorder %s175_s25, %s277_s26  ;;  %p283_p12 = scmp.lt.s32.totalorder %s277_s26, %s277_s26 }
  0x20   :  { %205 = vmatpush3.bf16.msra.mxu0 %v230_v2  ;;  %p284_p13 = por %p283_p12, %p282_p11 }
  0x21   :  { %206 = vmatprep.subr.bf16.mxu0 %v307_v0 }
  0x22   :  { %p285_p0 = pnand %p284_p13, %p278_p10 }
  0x24   :  { %207 = vmatpush3.bf16.msra.mxu0 %v231_v3 }
  0x25   :  { %208 = vmatprep.subr.bf16.mxu0 %v307_v0 }
  0x28   :  { %209 = vmatpush3.bf16.msra.mxu0 %v232_v4 }
  0x29   :  { %210 = vmatprep.subr.bf16.mxu0 %v307_v0 }
  0x2c   :  { %211 = vmatpush3.bf16.msra.mxu0 %v233_v5 }
  0x2d   :  { %212 = vmatprep.subr.bf16.mxu0 %v307_v0 }
  0x30   :  { %213 = vmatpush3.bf16.msra.mxu0 %v234_v6 }
  0x31   :  { %214 = vmatprep.subr.bf16.mxu0 %v307_v0 }
  0x34   :  { %215 = vmatpush3.bf16.msra.mxu0 %v235_v7 }
  0x35   :  { %216 = vmatprep.subr.bf16.mxu0 %v307_v0 }
  0x38   :  { %217 = vmatpush3.bf16.msra.mxu0 %v236_v8 }
  0x3b   :  { %219 = vmatmul.mubr.bf16.vlgmr.msra.gmra.mxu0 %v48_v9 }
  0xfb   :  { %v147_v11 = vpop.f32.mrf.mxu0 }
  0xfc   :  { %v166_v12 = vadd.f32 %v192_v10, %v147_v11 }
  0xfd   :  { %v220_v13 = vpop.f32.mrf.mxu0 }
  0xfe   :  { %167 = vst [vmem:[#allocation8] sm:$0xff] %v166_v12 }
  0xff   :  { %v150_v14 = vpop.f32.mrf.mxu0 }
 0x100   :  { %288 = shalt.err (!%p285_p0)
}
 0x101   :  { %177 = dma.vmem_to_hbm [thread:$0]  %s175_s25, 128, %s345_s3, [#allocation5]   ;;  %v221_v15 = vpop.f32.mrf.mxu0 }
 0x102   :  { %301 = dma.done.wait [#allocation5], 128  }
 0x103   :  { %302 = vsyncadd [#allocation5], 4294967168 }
 0x104   :  { %181 = vsyncpa [#allocation4], 1 }
 0x105   :  { %182 = vsyncpa [#allocation7], 1 }
 0x106   :  { %183 = vsyncpa [#allocation5], 1 }

</bundles_post_ra>
